<compile_context>
chip_gen: v7x
topology: tpu7x:2x2x1
jax: 0.10.0
libtpu: 0.0.40
codegen_flags: <defaults>
</compile_context>

<pallas_src>
import numpy as np
import jax
import jax.numpy as jnp
from jax.experimental import pallas as pl
from jax.experimental.pallas import tpu as pltpu

HIDDEN = 64          # module default hidden_dim
PBUF_LANES = 128     # packed-parameter buffer lane width (natural tile width)
TILE = 256           # batch elements (lanes) processed per grid step

# Packed parameter layout, one contiguous (N_ROWS, 128) f32 buffer:
#   rows 0..H-1, lanes 0..H-1 : W2^T            (MXU LHS for layer 2)
#   rows 0..H-1, lane  H+0    : w1[0, :]        (sin weights, column vector)
#   rows 0..H-1, lane  H+1    : w1[1, :]        (cos weights, column vector)
#   rows 0..H-1, lane  H+2    : b1              (column vector)
#   rows 0..H-1, lane  H+3    : b2              (column vector)
#   row  H,      lanes 0..H-1 : w3[:, 0]        (row vector, MXU LHS for layer 3)
#   row  H+1,    lane 0       : b3 scalar
COL_W1_SIN = HIDDEN + 0
COL_W1_COS = HIDDEN + 1
COL_B1 = HIDDEN + 2
COL_B2 = HIDDEN + 3
ROW_W3 = HIDDEN
ROW_B3 = HIDDEN + 1
N_ROWS = ((ROW_B3 + 1 + 7) // 8) * 8  # 72, sublane-aligned

assert HIDDEN + 4 <= PBUF_LANES, "packed layout requires HIDDEN + 4 <= 128"


def adaptive_weight_kernel(t_ref, p_ref, out_ref):
    # Batch on lanes, hidden on sublanes (transposed w.r.t. the PyTorch math).
    t = t_ref[...]                                   # (1, TILE)
    c = 2.0 * np.pi * 0.02
    s = jnp.sin(t * c)                               # (1, TILE)
    co = jnp.cos(t * c)                              # (1, TILE)

    # Static views into the single VMEM-resident packed parameter block.
    w2t = p_ref[0:HIDDEN, 0:HIDDEN]                          # (H, H) = W2^T
    w1s_c = p_ref[0:HIDDEN, COL_W1_SIN:COL_W1_SIN + 1]       # (H, 1)
    w1c_c = p_ref[0:HIDDEN, COL_W1_COS:COL_W1_COS + 1]       # (H, 1)
    b1_c = p_ref[0:HIDDEN, COL_B1:COL_B1 + 1]                # (H, 1)
    b2_c = p_ref[0:HIDDEN, COL_B2:COL_B2 + 1]                # (H, 1)
    w3_r = p_ref[ROW_W3:ROW_W3 + 1, 0:HIDDEN]                # (1, H)
    b3 = p_ref[ROW_B3:ROW_B3 + 1, 0:1]                       # (1, 1)

    # Linear(2, H) as two rank-1 broadcast updates (no lane-width-2 operand).
    h = w1s_c * s + w1c_c * co + b1_c                # (H, TILE)
    h = h * jax.nn.sigmoid(h)                        # SiLU via EUP logistic

    # Linear(H, H) on the MXU: (H, H) @ (H, TILE).
    h = jnp.dot(w2t, h, preferred_element_type=jnp.float32) + b2_c
    h = h * jax.nn.sigmoid(h)

    # Linear(H, 1) folded into an MXU pass -> lane-dense (1, TILE) result,
    # stored as an unmasked lane-dense slab.
    out_ref[...] = jnp.dot(w3_r, h, preferred_element_type=jnp.float32) + b3


def init_params(key, hidden=HIDDEN):
    """Deterministic synthetic init; weights stored as (in, out)."""
    ks = iter(jax.random.split(key, 8))

    def lin(fan_in, fan_out):
        w = jax.random.normal(next(ks), (fan_in, fan_out), jnp.float32)
        w = w * (1.0 / np.sqrt(fan_in))
        b = jax.random.normal(next(ks), (fan_out,), jnp.float32) * 0.01
        return w, b

    p = {}
    p["w1"], p["b1"] = lin(2, hidden)
    p["w2"], p["b2"] = lin(hidden, hidden)
    p["w3"], p["b3"] = lin(hidden, 1)
    return p


def pack_params(p):
    """Pack all weights/biases into one contiguous (N_ROWS, 128) f32 buffer."""
    buf = jnp.zeros((N_ROWS, PBUF_LANES), jnp.float32)
    buf = buf.at[0:HIDDEN, 0:HIDDEN].set(p["w2"].T)          # W2^T
    buf = buf.at[0:HIDDEN, COL_W1_SIN].set(p["w1"][0])
    buf = buf.at[0:HIDDEN, COL_W1_COS].set(p["w1"][1])
    buf = buf.at[0:HIDDEN, COL_B1].set(p["b1"])
    buf = buf.at[0:HIDDEN, COL_B2].set(p["b2"])
    buf = buf.at[ROW_W3, 0:HIDDEN].set(p["w3"][:, 0])
    buf = buf.at[ROW_B3, 0].set(p["b3"][0])
    return buf


def adaptive_weight_forward(t, packed_params, *, tile=TILE):
    """Pallas-kernel forward.  t: (B,), packed_params: (N_ROWS, 128) -> (B, 1)."""
    t = jnp.asarray(t, jnp.float32).reshape(-1)
    B = t.shape[0]
    n_tiles = max(1, -(-B // tile))
    B_pad = n_tiles * tile

    # Pad and reshape so each grid step sees one lane-dense (1, tile) slab.
    t_pad = jnp.zeros((B_pad,), jnp.float32).at[:B].set(t)
    t_blk = t_pad.reshape(n_tiles, 1, tile)

    out = pl.pallas_call(
        adaptive_weight_kernel,
        out_shape=jax.ShapeDtypeStruct((n_tiles, 1, tile), jnp.float32),
        grid_spec=pltpu.PrefetchScalarGridSpec(
            num_scalar_prefetch=0,
            grid=(n_tiles,),
            in_specs=[
                # t: one (1, tile) lane-dense slab per grid step.
                pl.BlockSpec((None, 1, tile), lambda i: (i, 0, 0)),
                # params: constant block index -> fetched once, VMEM-resident.
                pl.BlockSpec((N_ROWS, PBUF_LANES), lambda i: (0, 0)),
            ],
            out_specs=pl.BlockSpec((None, 1, tile), lambda i: (i, 0, 0)),
        ),
        compiler_params=pltpu.CompilerParams(
            # Megacore sharding on v7x (2 TCs); harmless no-op on v5e/v6e.
            dimension_semantics=("parallel",)),
        cost_estimate=pl.CostEstimate(
            flops=int(2 * B_pad * HIDDEN * HIDDEN + 8 * B_pad * HIDDEN),
            transcendentals=int(B_pad * (2 + 2 * HIDDEN)),
            bytes_accessed=int(N_ROWS * PBUF_LANES * 4 + 2 * B_pad * 4),
        ),
    )(t_blk, packed_params)

    return out.reshape(B_pad)[:B].reshape(B, 1)


def adaptive_weight_reference(t, p):
    """Pure-JAX reference mirroring the PyTorch module exactly."""
    c = 2.0 * np.pi * 0.02
    t_emb = jnp.stack([jnp.sin(t * c), jnp.cos(t * c)], axis=-1)  # (B, 2)
    hp = jax.lax.Precision.HIGHEST
    h = jax.nn.silu(jnp.dot(t_emb, p["w1"], precision=hp) + p["b1"])
    h = jax.nn.silu(jnp.dot(h, p["w2"], precision=hp) + p["b2"])
    return jnp.dot(h, p["w3"], precision=hp) + p["b3"]            # (B, 1)


if __name__ == "__main__":
    key = jax.random.PRNGKey(0)
    k_p, k_t1, k_t2 = jax.random.split(key, 3)

    params = init_params(k_p)
    packed = jax.block_until_ready(pack_params(params))  # pack once, reuse

    # Small batch (module-like usage; single grid step, padded to TILE lanes).
    t_small = jax.random.uniform(k_t1, (8,), jnp.float32) * 50.0
    out_small = jax.block_until_ready(adaptive_weight_forward(t_small, packed))
    ref_small = adaptive_weight_reference(t_small, params)
    np.testing.assert_allclose(np.asarray(out_small), np.asarray(ref_small),
                               rtol=1e-4, atol=1e-5)

    # Batched usage (amortizes launch/DMA; exercises grid, padding, residency).
    t_big = jax.random.uniform(k_t2, (600,), jnp.float32) * 50.0
    out_big = jax.block_until_ready(adaptive_weight_forward(t_big, packed))
    ref_big = adaptive_weight_reference(t_big, params)
    np.testing.assert_allclose(np.asarray(out_big), np.asarray(ref_big),
                               rtol=1e-4, atol=1e-5)

    print("KERNEL_OK")
</pallas_src>

<mosaic_0001>
module attributes {stable_mosaic.version = 11 : i64} {
  func.func @adaptive_weight_kernel(%arg0: i32, %arg1: memref<1x1x256xf32, #tpu.memory_space<vmem>>, %arg2: memref<72x128xf32, #tpu.memory_space<vmem>>, %arg3: memref<1x1x256xf32, #tpu.memory_space<vmem>>) attributes {dimension_semantics = [#tpu.dimension_semantics<parallel>], iteration_bounds = array<i64: 1>, scalar_prefetch = 0 : i64, scratch_operands = 0 : i64, tpu.core_type = #tpu.core_type<tc>, window_params = [{transform_indices = @transform_0, window_bounds = array<i64: 1, 1, 256>}, {pipeline_mode = #tpu.pipeline_mode<synchronous>, transform_indices = @transform_1, window_bounds = array<i64: 72, 128>}, {transform_indices = @transform_2, window_bounds = array<i64: 1, 1, 256>}]} {
    %c0 = arith.constant 0 : index
    %c0_0 = arith.constant 0 : index
    %c0_1 = arith.constant 0 : index
    %0 = vector.load %arg1[%c0, %c0_0, %c0_1] : memref<1x1x256xf32, #tpu.memory_space<vmem>>, vector<1x1x256xf32>
    %1 = vector.shape_cast %0 : vector<1x1x256xf32> to vector<1x256xf32>
    %cst = arith.constant 0.125663713 : f32
    %2 = vector.broadcast %cst : f32 to vector<1x256xf32>
    %3 = arith.mulf %1, %2 : vector<1x256xf32>
    %4 = math.sin %3 : vector<1x256xf32>
    %cst_2 = arith.constant 0.125663713 : f32
    %5 = vector.broadcast %cst_2 : f32 to vector<1x256xf32>
    %6 = arith.mulf %1, %5 : vector<1x256xf32>
    %7 = math.cos %6 : vector<1x256xf32>
    %c0_3 = arith.constant 0 : index
    %c0_4 = arith.constant 0 : index
    %8 = vector.load %arg2[%c0_3, %c0_4] : memref<72x128xf32, #tpu.memory_space<vmem>>, vector<64x64xf32>
    %c0_5 = arith.constant 0 : index
    %c64 = arith.constant 64 : index
    %9 = vector.load %arg2[%c0_5, %c64] : memref<72x128xf32, #tpu.memory_space<vmem>>, vector<64x1xf32>
    %c0_6 = arith.constant 0 : index
    %c65 = arith.constant 65 : index
    %10 = vector.load %arg2[%c0_6, %c65] : memref<72x128xf32, #tpu.memory_space<vmem>>, vector<64x1xf32>
    %c0_7 = arith.constant 0 : index
    %c66 = arith.constant 66 : index
    %11 = vector.load %arg2[%c0_7, %c66] : memref<72x128xf32, #tpu.memory_space<vmem>>, vector<64x1xf32>
    %c0_8 = arith.constant 0 : index
    %c67 = arith.constant 67 : index
    %12 = vector.load %arg2[%c0_8, %c67] : memref<72x128xf32, #tpu.memory_space<vmem>>, vector<64x1xf32>
    %c64_9 = arith.constant 64 : index
    %c0_10 = arith.constant 0 : index
    %13 = vector.load %arg2[%c64_9, %c0_10] : memref<72x128xf32, #tpu.memory_space<vmem>>, vector<1x64xf32>
    %c65_11 = arith.constant 65 : index
    %c0_12 = arith.constant 0 : index
    %14 = vector.load %arg2[%c65_11, %c0_12] : memref<72x128xf32, #tpu.memory_space<vmem>>, vector<1x1xf32>
    %15 = vector.broadcast %9 : vector<64x1xf32> to vector<64x256xf32>
    %16 = vector.broadcast %4 : vector<1x256xf32> to vector<64x256xf32>
    %17 = arith.mulf %15, %16 : vector<64x256xf32>
    %18 = vector.broadcast %10 : vector<64x1xf32> to vector<64x256xf32>
    %19 = vector.broadcast %7 : vector<1x256xf32> to vector<64x256xf32>
    %20 = arith.mulf %18, %19 : vector<64x256xf32>
    %21 = arith.addf %17, %20 : vector<64x256xf32>
    %22 = vector.broadcast %11 : vector<64x1xf32> to vector<64x256xf32>
    %23 = arith.addf %21, %22 : vector<64x256xf32>
    %24 = arith.negf %23 : vector<64x256xf32>
    %25 = math.exp %24 : vector<64x256xf32>
    %cst_13 = arith.constant 1.000000e+00 : f32
    %26 = vector.broadcast %cst_13 : f32 to vector<64x256xf32>
    %27 = arith.addf %26, %25 : vector<64x256xf32>
    %28 = arith.divf %26, %27 : vector<64x256xf32>
    %29 = arith.mulf %23, %28 : vector<64x256xf32>
    %cst_14 = arith.constant dense<0.000000e+00> : vector<64x256xf32>
    %30 = tpu.matmul %8, %29, %cst_14 {dimension_numbers = #tpu.dot_dimension_numbers<[1], [0], [0], [1], [0, 0, 1, 1], [], []>} : vector<64x64xf32>, vector<64x256xf32>, vector<64x256xf32> -> vector<64x256xf32>
    %31 = vector.broadcast %12 : vector<64x1xf32> to vector<64x256xf32>
    %32 = arith.addf %30, %31 : vector<64x256xf32>
    %33 = arith.negf %32 : vector<64x256xf32>
    %34 = math.exp %33 : vector<64x256xf32>
    %cst_15 = arith.constant 1.000000e+00 : f32
    %35 = vector.broadcast %cst_15 : f32 to vector<64x256xf32>
    %36 = arith.addf %35, %34 : vector<64x256xf32>
    %37 = arith.divf %35, %36 : vector<64x256xf32>
    %38 = arith.mulf %32, %37 : vector<64x256xf32>
    %cst_16 = arith.constant dense<0.000000e+00> : vector<1x256xf32>
    %39 = tpu.matmul %13, %38, %cst_16 {dimension_numbers = #tpu.dot_dimension_numbers<[1], [0], [0], [1], [0, 0, 1, 1], [], []>} : vector<1x64xf32>, vector<64x256xf32>, vector<1x256xf32> -> vector<1x256xf32>
    %40 = vector.broadcast %14 : vector<1x1xf32> to vector<1x256xf32>
    %41 = arith.addf %39, %40 : vector<1x256xf32>
    %c0_17 = arith.constant 0 : index
    %c0_18 = arith.constant 0 : index
    %c0_19 = arith.constant 0 : index
    %42 = vector.load %arg3[%c0_17, %c0_18, %c0_19] : memref<1x1x256xf32, #tpu.memory_space<vmem>>, vector<1x1x256xf32>
    %43 = vector.shape_cast %42 : vector<1x1x256xf32> to vector<1x256xf32>
    %44 = vector.shape_cast %41 : vector<1x256xf32> to vector<1x1x256xf32>
    tpu.vector_store %arg3[%c0_17, %c0_18, %c0_19], %44 {strides = array<i32>} : memref<1x1x256xf32, #tpu.memory_space<vmem>>, vector<1x1x256xf32>,
    return
  }
  func.func @transform_0(%arg0: i32) -> (i32, i32, i32) {
    %c0_i32 = arith.constant 0 : i32
    %c0_i32_0 = arith.constant 0 : i32
    %c0_i32_1 = arith.constant 0 : i32
    return %arg0, %c0_i32, %c0_i32_0 : i32, i32, i32
  }
  func.func @transform_1(%arg0: i32) -> (i32, i32) {
    %c0_i32 = arith.constant 0 : i32
    %c0_i32_0 = arith.constant 0 : i32
    %c0_i32_1 = arith.constant 0 : i32
    return %c0_i32, %c0_i32_0 : i32, i32
  }
  func.func @transform_2(%arg0: i32) -> (i32, i32, i32) {
    %c0_i32 = arith.constant 0 : i32
    %c0_i32_0 = arith.constant 0 : i32
    %c0_i32_1 = arith.constant 0 : i32
    return %arg0, %c0_i32, %c0_i32_0 : i32, i32, i32
  }
}

</mosaic_0001>

<bundles_post_ra>
// kernel: tpu_custom_call.1
= control target key start
LH: loop header
LB: loop body
LE: loop exit
PB: predicated region body
PF: predicated region fallthrough
CT: control target
= control target key end

     0   :  { %7 = vsyncpa [#allocation3], 0  ;;  %s1644_s0 = inlined_call_operand.hbm [shape: f32[1,1,256], index: 0, kind: input, shape index: {}]   ;;  %s1645_s1 = inlined_call_operand.hbm [shape: f32[72,128], index: 1, kind: input, shape index: {}]   ;;  %s1646_s2 = inlined_call_operand.hbm [shape: f32[1,1,256], index: 2, kind: output, shape index: {}]  }
   0x1   :  { %8 = vsyncpa [#allocation6], 0 }
   0x2   :  { %9 = vsyncpa [#allocation4], 0  ;;  %s1275_s9 = smov [#allocation2]   ;;  %s1276_s11 = smov [#allocation5]  }
   0x3   :  { %s16_s10 = sshll.u32 %s1275_s9, 4  ;;  %s25_s12 = sshll.u32 %s1276_s11, 4  ;;  %s17_s10 = int_to_ptr.vmem [resolvable:$true] %s16_s10  ;;  %s1308_s12 = int_to_ptr.vmem [resolvable:$true] %s25_s12 }
   0x4   :  { %s1203_s15 = scalar_lea.hbm %s1644_s0, 32 }
   0x5   :  { %p1204_p0 = scmp.ne.s32.totalorder %s1644_s0, %s1203_s15  ;;  %p1207_p1 = scmp.lt.u32.totalorder %s1203_s15, %s1644_s0 }
   0x7   :  { %p1209_p2 = pnand %p1207_p1, %p1204_p0 }
   0x9   :  { %1212 = shalt.err (!%p1209_p2)
}
   0xa   :  { %s1213_s20 = scalar_lea.vmem %s17_s10, 32  ;;  %p1218_p4 = scmp.lt.s32.totalorder %s17_s10, %s17_s10 }
   0xb   :  { %p1214_p3 = scmp.ne.s32.totalorder %s17_s10, %s1213_s20  ;;  %p1219_p5 = scmp.lt.s32.totalorder %s1213_s20, %s1213_s20 }
   0xd   :  { %p1220_p6 = por %p1219_p5, %p1218_p4 }
   0xf   :  { %p1221_p7 = pnand %p1220_p6, %p1214_p3 }
  0x11   :  { %1224 = shalt.err (!%p1221_p7)
}
  0x12   :  { %19 = dma.hbm_to_vmem [thread:$0]  %s1644_s0, 32, %s17_s10, [#allocation3]  }
  0x13   :  { %s1225_s25 = scalar_lea.hbm %s1645_s1, 1152 }
  0x14   :  { %p1226_p8 = scmp.ne.s32.totalorder %s1645_s1, %s1225_s25  ;;  %p1229_p9 = scmp.lt.u32.totalorder %s1225_s25, %s1645_s1 }
  0x16   :  { %p1231_p10 = pnand %p1229_p9, %p1226_p8 }
  0x18   :  { %1234 = shalt.err (!%p1231_p10)
}
  0x19   :  { %s1235_s30 = scalar_lea.vmem %s1308_s12, 1152  ;;  %p1240_p12 = scmp.lt.s32.totalorder %s1308_s12, %s1308_s12 }
  0x1a   :  { %p1236_p11 = scmp.ne.s32.totalorder %s1308_s12, %s1235_s30  ;;  %p1241_p13 = scmp.lt.s32.totalorder %s1235_s30, %s1235_s30 }
  0x1c   :  { %p1242_p0 = por %p1241_p13, %p1240_p12 }
  0x1e   :  { %p1243_p1 = pnand %p1242_p0, %p1236_p11 }
  0x20   :  { %1246 = shalt.err (!%p1243_p1)
}
  0x21   :  { %s1277_s0 = smov 128   ;;  %s1278_s3 = smov 8  }
  0x22   :  { %31 = dma.hbm_to_vmem [thread:$0]  %s1645_s1, 1152, %s1308_s12, [#allocation6], %s1277_s0, %s1277_s0, %s1278_s3  }
  0x23   :  { %1269 = dma.done.wait [#allocation3], 32  }
  0x24   :  { %1270 = vsyncadd [#allocation3], 4294967264 }
  0x25   :  { %1271 = dma.done.wait [#allocation6], 1152  }
  0x26   :  { %1272 = vsyncadd [#allocation6], 4294966144  ;;  %v1279_v0 = vmov 65   ;;  %v1280_v1 = vmov 64   ;;  %v1341_v2 = vld [vmem:[#allocation5] sm:$0xff]  ;;  %v1345_v3 = vld [vmem:[#allocation5 + $0x8] sm:$0xff] }
  0x27   :  { %1055 = vset.pattern.permute.xlu1 %v1279_v0  ;;  %1054 = vset.pattern.permute.xlu0 %v1280_v1  ;;  %v38_v4 = vld [vmem:[#allocation2] sm:$0x3]  ;;  %v1352_v7 = vld [vmem:[#allocation5 + $0x10] sm:$0xff]  ;;  %v1366_v15 = vld [vmem:[#allocation5 + $0x20] sm:$0xff]  ;;  %v1281_v19 = vmov 683565275  }
  0x28   :  { %325 = vperm.xlu1 %1055, %v1341_v2   ;;  %259 = vperm.xlu0 %1054, %v1341_v2   ;;  %v1347_v5 = vmul.f32 0.12566371, %v38_v4  ;;  %v1354_v8 = vld [vmem:[#allocation5 + $0x18] sm:$0xff]  ;;  %v1282_v21 = vmov 2475754826   ;;  %v1286_v30 = vmov 66  }
  0x29   :  { %v1283_v23 = vmov 2131351028   ;;  %v1284_v26 = vmov 2102212464   ;;  %v1285_v28 = vmov 920167782  }
  0x2a   :  { %v43_v6 = vand.u32 2139095040, %v1347_v5  ;;  %v40_v11 = vand.u32 2147483647, %v1347_v5  ;;  %v1370_v31 = vld [vmem:[#allocation5 + $0x30] sm:$0xff]  ;;  %v1287_v37 = vmov 1326507024   ;;  %vm132_vm15 = vweird.f32 %v1347_v5 }
  0x2b   :  { %v1380_v54 = vld [vmem:[#allocation5 + $0x28] sm:$0xff]  ;;  %vm42_vm7 = vcmp.lt.s32.totalorder %v1347_v5, 0  ;;  %s1292_s1 = smov [#allocation7]  }
  0x2c   :  { %329 = vperm.xlu1 %1055, %v1345_v3   ;;  %264 = vperm.xlu0 %1054, %v1345_v3   ;;  %v44_v9 = vshrl.u32 %v43_v6, 23  ;;  %v47_v13 = vand.u32 8388607, %v40_v11  ;;  %vm41_vm8 = vcmp.le.f32.partialorder %v40_v11, 0.7853982  ;;  %s941_s6 = sshll.u32 %s1292_s1, 4  ;;  %s942_s6 = int_to_ptr.vmem [resolvable:$true] %s941_s6 }
  0x2d   :  { %s1247_s7 = scalar_lea.vmem %s942_s6, 32  ;;  %p1252_p3 = scmp.lt.s32.totalorder %s942_s6, %s942_s6 }
  0x2e   :  { %v951_v10 = vadd.s32 4294967169, %v44_v9  ;;  %v48_v25 = vor.u32 8388608, %v47_v13  ;;  %p1248_p2 = scmp.ne.s32.totalorder %s942_s6, %s1247_s7  ;;  %p1253_p4 = scmp.lt.s32.totalorder %s1247_s7, %s1247_s7 }
  0x30   :  { %1056 = vset.pattern.permute.xlu1 %v1280_v1  ;;  %269 = vperm.xlu0 %1054, %v1352_v7   ;;  %v50_v12 = vadd.s32 1, %v951_v10  ;;  %v88_v44 = vshll.u32 %v48_v25, 8  ;;  %p1254_p5 = por %p1253_p4, %p1252_p3 }
  0x31   :  { %274 = vperm.xlu1 %1056, %v1354_v8  }
  0x32   :  { %vm51_vm0 = vcmp.gt.s32.totalorder %v50_v12, 0  ;;  %p1255_p6 = pnand %p1254_p5, %p1248_p2 }
  0x33   :  { %v52_v14 = vsel %vm51_vm0, %v50_v12, 0  ;;  %v1404_v12 = vld [vmem:[#allocation5 + $0x38] sm:$0xff]  ;;  %vm591_vm0 = vcmask 523264  }
  0x34   :  { %1057 = vset.pattern.permute.xlu0 %v1279_v0  ;;  %v54_v16 = vand.u32 31, %v52_v14  ;;  %v53_v17 = vshrl.u32 %v52_v14, 5 }
  0x35   :  { %1058 = vset.pattern.permute.xlu1 %v1279_v0  ;;  %333 = vperm.xlu0 %1057, %v1352_v7  }
  0x36   :  { %337 = vperm.xlu1 %1058, %v1354_v8   ;;  %v55_v18 = vsub.s32 32, %v54_v16  ;;  %v57_v20 = vshll.u32 %v1281_v19, %v54_v16  ;;  %v60_v22 = vshll.u32 %v1282_v21, %v54_v16  ;;  %v63_v24 = vshll.u32 %v1283_v23, %v54_v16 }
  0x37   :  { %v66_v27 = vshll.u32 %v1284_v26, %v54_v16  ;;  %v69_v29 = vshll.u32 %v1285_v28, %v54_v16  ;;  %vm72_vm1 = vcmp.lt.s32.totalorder %v53_v17, 1  ;;  %vm75_vm2 = vcmp.lt.s32.totalorder %v53_v17, 4 }
  0x38   :  { %v58_v32 = vshrl.u32 %v1282_v21, %v55_v18  ;;  %v61_v33 = vshrl.u32 %v1283_v23, %v55_v18  ;;  %v64_v34 = vshrl.u32 %v1284_v26, %v55_v18  ;;  %v56_v35 = vshrl.u32 %v1281_v19, %v55_v18 }
  0x39   :  { %341 = vperm.xlu0 %1057, %v1366_v15   ;;  %v67_v36 = vshrl.u32 %v1285_v28, %v55_v18  ;;  %v70_v38 = vshrl.u32 %v1287_v37, %v55_v18  ;;  %vm74_vm3 = vcmp.lt.s32.totalorder %v53_v17, 3  ;;  %vm73_vm4 = vcmp.lt.s32.totalorder %v53_v17, 2 }
  0x3a   :  { %1059 = vset.pattern.permute.xlu1 %v1286_v30  ;;  %v59_v39 = vor.u32 %v58_v32, %v57_v20  ;;  %v62_v40 = vor.u32 %v61_v33, %v60_v22  ;;  %v65_v41 = vor.u32 %v64_v34, %v63_v24  ;;  %v1288_v33 = vmov 0.0  }
  0x3b   :  { %400 = vperm.xlu1 %1059, %v1341_v2   ;;  %v68_v42 = vor.u32 %v67_v36, %v66_v27  ;;  %v71_v43 = vor.u32 %v70_v38, %v69_v29  ;;  %672 = vmatprep.mubr.f32.mxu0 %v1288_v33 }
  0x3c   :  { %v77_v45 = vsel %vm75_vm2, %v65_v41, 2102212464  ;;  %v80_v46 = vsel %vm72_vm1, %v59_v39, %v62_v40  ;;  %v84_v47 = vsel %vm72_vm1, %v62_v40, %v65_v41  ;;  %v76_v50 = vsel %vm72_vm1, %v56_v35, %v59_v39  ;;  %905 = vmatprep.mubr.f32.mxu1 %v1288_v33 }
  0x3d   :  { %349 = vperm.xlu0 %1057, %v1370_v31   ;;  %v81_v48 = vsel %vm75_vm2, %v68_v42, 920167782  ;;  %v85_v49 = vsel %vm75_vm2, %v71_v43, 1326507024  ;;  %v78_v51 = vsel %vm74_vm3, %v62_v40, %v77_v45 }
  0x3e   :  { %v82_v52 = vsel %vm74_vm3, %v65_v41, %v81_v48  ;;  %v86_v53 = vsel %vm74_vm3, %v68_v42, %v85_v49  ;;  %v79_v61 = vsel %vm73_vm4, %v76_v50, %v78_v51 }
  0x3f   :  { %1060 = vset.pattern.permute.xlu1 %v1280_v1  ;;  %v83_v55 = vsel %vm73_vm4, %v80_v46, %v82_v52  ;;  %v87_v56 = vsel %vm73_vm4, %v84_v47, %v86_v53  ;;  %v95_v62 = vmul.u32 %v88_v44, %v79_v61 }
  0x40   :  { %279 = vperm.xlu1 %1060, %v1366_v15   ;;  %v1385_v57 = vmul.u32.u64.low %v88_v44, %v87_v56  ;;  %v1386_v58 = vmul.u32.u64.high %v88_v44, %v87_v56, %v1385_v57  ;;  %v1388_v59 = vmul.u32.u64.low %v88_v44, %v83_v55  ;;  %v1389_v60 = vmul.u32.u64.high %v88_v44, %v83_v55, %v1388_v59 }
  0x41   :  { %1064 = vset.pattern.permute.xlu0 %v1286_v30  ;;  %v298_v44 = vlaneseq }
  0x42   :  { %404 = vperm.xlu0 %1064, %v1345_v3   ;;  %vm97_vm5 = vc.u32 %v1386_v58, %v1388_v59  ;;  %v98_v63 = vadd.s32 1, %v1389_v60  ;;  %v96_v21 = vadd.s32 %v1388_v59, %v1386_v58  ;;  %v1289_v58 = vmov 67  }
  0x43   :  { %v1421_v52 = vshrl.u32 %v298_v44, 7  ;;  %vm932_vm1 = vcmp.lt.s32.totalorder %v298_v44, 256 }
  0x44   :  { %284 = vperm.xlu1 %1060, %v1380_v54   ;;  %v99_v4 = vsel %vm97_vm5, %v98_v63, %v1389_v60 }
  0x45   :  { %v100_v6 = vadd.s32 %v99_v4, %v95_v62  ;;  %v300_v59 = vsub.s32 0, %v1421_v52  ;;  %v304_v60 = vsub.s32 1, %v1421_v52 }
  0x46   :  { %412 = vperm.xlu0 %1064, %v1354_v8  }
  0x47   :  { %v101_v9 = vadd.s32 536870912, %v100_v6 }
  0x48   :  { %1061 = vset.pattern.permute.xlu1 %v1279_v0 }
  0x49   :  { %345 = vperm.xlu1 %1061, %v1380_v54   ;;  %v102_v10 = vshrl.u32 %v101_v9, 30 }
  0x4a   :  { %420 = vperm.xlu0 %1064, %v1380_v54  }
  0x4b   :  { %v103_v13 = vshll.u32 %v102_v10, 30  ;;  %v126_v35 = vsub.s32 4, %v102_v10 }
  0x4d   :  { %1062 = vset.pattern.permute.xlu1 %v1286_v30  ;;  %v104_v14 = vsub.s32 %v100_v6, %v103_v13  ;;  %v127_v37 = vsel %vm42_vm7, %v126_v35, %v102_v10 }
  0x4e   :  { %408 = vperm.xlu1 %1062, %v1352_v7   ;;  %v129_v38 = vsel %vm41_vm8, 0, %v127_v37  ;;  %1067 = vset.pattern.permute.xlu0 %v1289_v58 }
  0x4f   :  { %v106_v16 = vsub.s32 0, %v104_v14  ;;  %v133_v39 = vadd.s32 3, %v129_v38  ;;  %v237_v42 = vand.u32 3, %v129_v38  ;;  %560 = vperm.xlu0 %1067, %v1341_v2  }
  0x51   :  { %v952_v17 = vmin.u32 %v106_v16, %v104_v14  ;;  %v134_v43 = vand.u32 3, %v133_v39  ;;  %vm239_vm9 = vcmp.eq.s32.totalorder %v237_v42, 0  ;;  %vm242_vm10 = vcmp.eq.s32.totalorder %v237_v42, 2 }
  0x52   :  { %1063 = vset.pattern.permute.xlu1 %v1280_v1  ;;  %vm238_vm13 = vcmp.lt.s32.totalorder %v237_v42, 2 }
  0x53   :  { %289 = vperm.xlu1 %1063, %v1370_v31   ;;  %v108_v1 = vclz %v952_v17  ;;  %vm136_vm11 = vcmp.eq.s32.totalorder %v134_v43, 0  ;;  %vm139_vm12 = vcmp.eq.s32.totalorder %v134_v43, 2  ;;  %vm135_vm14 = vcmp.lt.s32.totalorder %v134_v43, 2  ;;  %572 = vperm.xlu0 %1067, %v1354_v8  }
  0x55   :  { %v953_v18 = vadd.s32 4294967294, %v108_v1 }
  0x57   :  { %294 = vperm.xlu1 %1063, %v1404_v12   ;;  %vm954_vm6 = vcmp.lt.s32.totalorder %v953_v18, 0  ;;  %580 = vperm.xlu0 %1067, %v1380_v54  }
  0x58   :  { %v111_v19 = vsel %vm954_vm6, 0, %v953_v18 }
  0x59   :  { %v116_v20 = vsub.s32 4294967266, %v111_v19  ;;  %v113_v23 = vshll.u32 %v104_v14, %v111_v19 }
  0x5b   :  { %1065 = vset.pattern.permute.xlu1 %v1279_v0  ;;  %v112_v0 = vsub.s32 32, %v111_v19  ;;  %v117_v22 = vadd.s32 127, %v116_v20  ;;  %588 = vperm.xlu0 %1067, %v1404_v12  }
  0x5c   :  { %353 = vperm.xlu1 %1065, %v1404_v12  }
  0x5d   :  { %v114_v24 = vshrl.u32 %v96_v21, %v112_v0  ;;  %v118_v25 = vshll.u32 %v117_v22, 23 }
  0x5f   :  { %v115_v26 = vor.u32 %v114_v24, %v113_v23  ;;  %v119_v27 = vor.u32 4788187, %v118_v25 }
  0x60   :  { %1066 = vset.pattern.permute.xlu1 %v1286_v30 }
  0x61   :  { %416 = vperm.xlu1 %1066, %v1366_v15   ;;  %v120_v28 = vand.u32 2147483647, %v119_v27  ;;  %v122_v29 = vcvt.s32.f32 %v115_v26 }
  0x63   :  { %v123_v30 = vmul.f32 %v122_v29, %v120_v28 }
  0x65   :  { %424 = vperm.xlu1 %1066, %v1370_v31   ;;  %v124_v32 = vxor.u32 2147483648, %v123_v30 }
  0x67   :  { %v125_v34 = vsel %vm42_vm7, %v124_v32, %v123_v30 }
  0x68   :  { %v128_v36 = vsel %vm41_vm8, %v1347_v5, %v125_v34 }
  0x69   :  { %428 = vperm.xlu1 %1066, %v1404_v12   ;;  %1071 = vcosq.f32 %v128_v36 }
  0x6a   :  { %1073 = vsinq.f32 %v128_v36 }
  0x6d   :  { %1068 = vset.pattern.permute.xlu1 %v1289_v58 }
  0x6e   :  { %564 = vperm.xlu1 %1068, %v1345_v3  }
  0x72   :  { %568 = vperm.xlu1 %1068, %v1352_v7  }
  0x73   :  { %v1072_v40 = vpop.eup %1071 }
  0x74   :  { %v1074_v41 = vpop.eup %1073  ;;  %v140_v46 = vxor.u32 2147483648, %v1072_v40 }
  0x75   :  { %v137_v45 = vxor.u32 2147483648, %v1074_v41 }
  0x76   :  { %v244_v49 = vsel %vm242_vm10, %v140_v46, %v1074_v41  ;;  %v141_v51 = vsel %vm139_vm12, %v140_v46, %v1074_v41  ;;  %576 = vperm.xlu1 %1068, %v1366_v15  }
  0x77   :  { %v241_v48 = vsel %vm239_vm9, %v1072_v40, %v137_v45  ;;  %v138_v50 = vsel %vm136_vm11, %v1072_v40, %v137_v45 }
  0x78   :  { %v245_v53 = vsel %vm238_vm13, %v241_v48, %v244_v49  ;;  %v142_v55 = vsel %vm135_vm14, %v138_v50, %v141_v51 }
  0x79   :  { %v246_v61 = vsel %vm132_vm15, nan, %v245_v53  ;;  %v143_v62 = vsel %vm132_vm15, nan, %v142_v55 }
  0x7a   :  { %v1429_v5 = vrot.slane %v246_v61, %v300_v59  ;;  %v1431_v6 = vrot.slane %v246_v61, %v304_v60  ;;  %v1433_v9 = vrot.slane %v143_v62, %v300_v59  ;;  %v1435_v10 = vrot.slane %v143_v62, %v304_v60  ;;  %584 = vperm.xlu1 %1068, %v1370_v31  }
  0xa7   :  { %v326_v11 = vpop.permute.xlu1 %325  ;;  %v260_v47 = vpop.permute.xlu0 %259 }
  0xa8   :  { %v367_v14 = vmul.f32 %v1429_v5, %v326_v11  ;;  %v368_v16 = vmul.f32 %v1431_v6, %v326_v11  ;;  %v308_v17 = vmul.f32 %v1433_v9, %v260_v47  ;;  %v309_v1 = vmul.f32 %v1435_v10, %v260_v47 }
  0xaa   :  { %v383_v20 = vadd.f32 %v367_v14, %v308_v17  ;;  %v384_v21 = vadd.f32 %v368_v16, %v309_v1 }
  0xab   :  { %v330_v56 = vpop.permute.xlu1 %329  ;;  %v265_v57 = vpop.permute.xlu0 %264 }
  0xac   :  { %v369_v24 = vmul.f32 %v1429_v5, %v330_v56  ;;  %v370_v25 = vmul.f32 %v1431_v6, %v330_v56  ;;  %v310_v26 = vmul.f32 %v1433_v9, %v265_v57  ;;  %v311_v27 = vmul.f32 %v1435_v10, %v265_v57 }
  0xae   :  { %v385_v35 = vadd.f32 %v369_v24, %v310_v26  ;;  %v386_v36 = vadd.f32 %v370_v25, %v311_v27 }
  0xaf   :  { %v270_v63 = vpop.permute.xlu0 %269 }
  0xb0   :  { %v275_v4 = vpop.permute.xlu1 %274  ;;  %v312_v51 = vmul.f32 %v1433_v9, %v270_v63  ;;  %v313_v53 = vmul.f32 %v1435_v10, %v270_v63 }
  0xb1   :  { %v314_v39 = vmul.f32 %v1433_v9, %v275_v4  ;;  %v315_v42 = vmul.f32 %v1435_v10, %v275_v4 }
  0xb4   :  { %v334_v13 = vpop.permute.xlu0 %333 }
  0xb5   :  { %v338_v18 = vpop.permute.xlu1 %337  ;;  %v371_v55 = vmul.f32 %v1429_v5, %v334_v13  ;;  %v372_v56 = vmul.f32 %v1431_v6, %v334_v13 }
  0xb6   :  { %v373_v34 = vmul.f32 %v1429_v5, %v338_v18  ;;  %v374_v37 = vmul.f32 %v1431_v6, %v338_v18 }
  0xb7   :  { %v387_v4 = vadd.f32 %v371_v55, %v312_v51  ;;  %v388_v14 = vadd.f32 %v372_v56, %v313_v53 }
  0xb8   :  { %v1444_v19 = vpop.permute.xlu0 %341  ;;  %v389_v11 = vadd.f32 %v373_v34, %v314_v39  ;;  %v390_v48 = vadd.f32 %v374_v37, %v315_v42 }
  0xb9   :  { %v376_v51 = vmul.f32 %v1431_v6, %v1444_v19 }
  0xba   :  { %v401_v0 = vpop.permute.xlu1 %400 }
  0xbb   :  { %v1448_v22 = vadd.f32 %v401_v0, %v383_v20  ;;  %v1450_v23 = vadd.f32 %v401_v0, %v384_v21 }
  0xbc   :  { %v1456_v28 = vpop.permute.xlu0 %349 }
  0xbd   :  { %v959_v29 = vmul.f32 -1.442695, %v1448_v22  ;;  %v960_v30 = vmul.f32 -1.442695, %v1450_v23 }
  0xbf   :  { %v1460_v32 = vpop.permute.xlu1 %279  ;;  %1075 = vpow2.f32 %v959_v29 }
  0xc0   :  { %1077 = vpow2.f32 %v960_v30  ;;  %v317_v53 = vmul.f32 %v1435_v10, %v1460_v32 }
  0xc1   :  { %v405_v38 = vpop.permute.xlu0 %404 }
  0xc2   :  { %v1465_v40 = vadd.f32 %v405_v38, %v385_v35  ;;  %v1467_v41 = vadd.f32 %v405_v38, %v386_v36 }
  0xc3   :  { %v285_v43 = vpop.permute.xlu1 %284 }
  0xc4   :  { %v961_v45 = vmul.f32 -1.442695, %v1465_v40  ;;  %v962_v46 = vmul.f32 -1.442695, %v1467_v41  ;;  %v318_v17 = vmul.f32 %v1433_v9, %v285_v43  ;;  %v319_v21 = vmul.f32 %v1435_v10, %v285_v43 }
  0xc5   :  { %v413_v47 = vpop.permute.xlu0 %412 }
  0xc6   :  { %1079 = vpow2.f32 %v961_v45  ;;  %v1472_v49 = vadd.f32 %v413_v47, %v389_v11  ;;  %v1474_v50 = vadd.f32 %v413_v47, %v390_v48  ;;  %v316_v11 = vmul.f32 %v1433_v9, %v1460_v32 }
  0xc7   :  { %1081 = vpow2.f32 %v962_v46  ;;  %v375_v46 = vmul.f32 %v1429_v5, %v1444_v19 }
  0xc8   :  { %v346_v57 = vpop.permute.xlu1 %345  ;;  %v965_v59 = vmul.f32 -1.442695, %v1472_v49  ;;  %v966_v61 = vmul.f32 -1.442695, %v1474_v50 }
  0xc9   :  { %v1076_v58 = vpop.eup %1075  ;;  %v377_v62 = vmul.f32 %v1429_v5, %v346_v57  ;;  %v378_v63 = vmul.f32 %v1431_v6, %v346_v57  ;;  %v421_v27 = vpop.permute.xlu0 %420 }
  0xca   :  { %v1078_v60 = vpop.eup %1077  ;;  %v495_v16 = vadd.f32 1.0, %v1076_v58  ;;  %1083 = vpow2.f32 %v965_v59 }
  0xcb   :  { %v496_v18 = vadd.f32 1.0, %v1078_v60  ;;  %1085 = vpow2.f32 %v966_v61  ;;  %v393_v24 = vadd.f32 %v377_v62, %v318_v17  ;;  %v394_v29 = vadd.f32 %v378_v63, %v319_v21 }
  0xcc   :  { %1087 = vrcp.f32 %v495_v16  ;;  %v379_v60 = vmul.f32 %v1429_v5, %v1456_v28  ;;  %v391_v61 = vadd.f32 %v375_v46, %v316_v11  ;;  %v392_v17 = vadd.f32 %v376_v51, %v317_v53 }
  0xcd   :  { %v409_v1 = vpop.permute.xlu1 %408  ;;  %1089 = vrcp.f32 %v496_v18  ;;  %v1492_v37 = vadd.f32 %v421_v27, %v393_v24  ;;  %v1494_v38 = vadd.f32 %v421_v27, %v394_v29  ;;  %v380_v21 = vmul.f32 %v1431_v6, %v1456_v28 }
  0xce   :  { %v1485_v13 = vadd.f32 %v409_v1, %v387_v4  ;;  %v1487_v20 = vadd.f32 %v409_v1, %v388_v14 }
  0xcf   :  { %v969_v43 = vmul.f32 -1.442695, %v1492_v37  ;;  %v970_v47 = vmul.f32 -1.442695, %v1494_v38 }
  0xd0   :  { %v1080_v0 = vpop.eup %1079  ;;  %v963_v30 = vmul.f32 -1.442695, %v1485_v13  ;;  %v964_v35 = vmul.f32 -1.442695, %v1487_v20 }
  0xd1   :  { %v1082_v25 = vpop.eup %1081  ;;  %v497_v26 = vadd.f32 1.0, %v1080_v0 }
  0xd2   :  { %v498_v34 = vadd.f32 1.0, %v1082_v25  ;;  %v290_v36 = vpop.permute.xlu1 %289 }
  0xd3   :  { %1091 = vrcp.f32 %v497_v26  ;;  %v320_v4 = vmul.f32 %v1433_v9, %v290_v36  ;;  %v321_v14 = vmul.f32 %v1435_v10, %v290_v36 }
  0xd4   :  { %1093 = vrcp.f32 %v498_v34  ;;  %v1084_v42 = vpop.eup %1083 }
  0xd5   :  { %1095 = vpow2.f32 %v963_v30  ;;  %v1086_v45 = vpop.eup %1085  ;;  %v501_v55 = vadd.f32 1.0, %v1084_v42  ;;  %v396_v30 = vadd.f32 %v380_v21, %v321_v14 }
  0xd6   :  { %1097 = vpow2.f32 %v964_v35  ;;  %v295_v39 = vpop.permute.xlu1 %294  ;;  %v1088_v48 = vpop.eup %1087  ;;  %v502_v58 = vadd.f32 1.0, %v1086_v45 }
  0xd7   :  { %v1090_v57 = vpop.eup %1089  ;;  %1099 = vpow2.f32 %v969_v43  ;;  %v543_v19 = vmul.f32 %v1088_v48, %v1448_v22  ;;  %v322_v35 = vmul.f32 %v1433_v9, %v295_v39  ;;  %v323_v42 = vmul.f32 %v1435_v10, %v295_v39 }
  0xd8   :  { %1101 = vpow2.f32 %v970_v47  ;;  %v544_v63 = vmul.f32 %v1090_v57, %v1450_v23  ;;  %v395_v23 = vadd.f32 %v379_v60, %v320_v4 }
  0xd9   :  { %1103 = vrcp.f32 %v501_v55 }
  0xda   :  { %1105 = vrcp.f32 %v502_v58 }
  0xdb   :  { %v354_v56 = vpop.permute.xlu1 %353 }
  0xdc   :  { %v381_v29 = vmul.f32 %v1429_v5, %v354_v56 }
  0xdd   :  { %v1092_v59 = vpop.eup %1091 }
  0xde   :  { %v1094_v62 = vpop.eup %1093  ;;  %v545_v32 = vmul.f32 %v1092_v59, %v1465_v40  ;;  %v397_v47 = vadd.f32 %v381_v29, %v322_v35 }
  0xdf   :  { %v1096_v16 = vpop.eup %1095  ;;  %v546_v1 = vmul.f32 %v1094_v62, %v1467_v41  ;;  %v382_v41 = vmul.f32 %v1431_v6, %v354_v56 }
  0xe0   :  { %v1098_v18 = vpop.eup %1097  ;;  %v499_v0 = vadd.f32 1.0, %v1096_v16  ;;  %v417_v24 = vpop.permute.xlu1 %416  ;;  %v1002_v25 = vpack.c.bf16 %v545_v32, %v543_v19 }
  0xe1   :  { %v500_v26 = vadd.f32 1.0, %v1098_v18  ;;  %v1516_v27 = vadd.f32 %v417_v24, %v391_v61  ;;  %v1518_v22 = vadd.f32 %v417_v24, %v392_v17  ;;  %v1000_v40 = vpack.c.bf16 %v546_v1, %v544_v63  ;;  %v1100_v45 = vpop.eup %1099 }
  0xe2   :  { %1107 = vrcp.f32 %v499_v0  ;;  %v1102_v46 = vpop.eup %1101  ;;  %v398_v48 = vadd.f32 %v382_v41, %v323_v42  ;;  %v505_v58 = vadd.f32 1.0, %v1100_v45 }
  0xe3   :  { %1109 = vrcp.f32 %v500_v26  ;;  %v967_v28 = vmul.f32 -1.442695, %v1516_v27  ;;  %v968_v34 = vmul.f32 -1.442695, %v1518_v22  ;;  %1001 = vmatprep.subr.bf16.mxu0 %v1000_v40  ;;  %v1104_v9 = vpop.eup %1103  ;;  %v506_v61 = vadd.f32 1.0, %v1102_v46 }
  0xe4   :  { %1003 = vmatpush1.bf16.msra.mxu0 %v1002_v25  ;;  %v425_v36 = vpop.permute.xlu1 %424  ;;  %v1106_v10 = vpop.eup %1105  ;;  %v549_v60 = vmul.f32 %v1104_v9, %v1472_v49 }
  0xe5   :  { %1111 = vpow2.f32 %v967_v28  ;;  %v1526_v43 = vadd.f32 %v425_v36, %v395_v23  ;;  %v1528_v5 = vadd.f32 %v425_v36, %v396_v30  ;;  %v550_v4 = vmul.f32 %v1106_v10, %v1474_v50 }
  0xe6   :  { %1113 = vpow2.f32 %v968_v34 }
  0xe7   :  { %v971_v6 = vmul.f32 -1.442695, %v1526_v43  ;;  %v972_v11 = vmul.f32 -1.442695, %v1528_v5 }
  0xe8   :  { %v429_v51 = vpop.permute.xlu1 %428 }
  0xe9   :  { %1115 = vpow2.f32 %v971_v6  ;;  %v445_v53 = vadd.f32 %v429_v51, %v397_v47  ;;  %v446_v55 = vadd.f32 %v429_v51, %v398_v48 }
  0xea   :  { %1117 = vpow2.f32 %v972_v11 }
  0xeb   :  { %v973_v39 = vmul.f32 -1.442695, %v445_v53  ;;  %v974_v56 = vmul.f32 -1.442695, %v446_v55 }
  0xec   :  { %v1108_v57 = vpop.eup %1107 }
  0xed   :  { %v1110_v59 = vpop.eup %1109  ;;  %v547_v62 = vmul.f32 %v1108_v57, %v1485_v13  ;;  %1119 = vpow2.f32 %v973_v39 }
  0xee   :  { %v548_v14 = vmul.f32 %v1110_v59, %v1487_v20  ;;  %1121 = vpow2.f32 %v974_v56 }
  0xef   :  { %v1112_v19 = vpop.eup %1111  ;;  %v1006_v32 = vpack.c.bf16 %v549_v60, %v547_v62  ;;  %1123 = vrcp.f32 %v505_v58 }
  0xf0   :  { %v1114_v16 = vpop.eup %1113  ;;  %v503_v17 = vadd.f32 1.0, %v1112_v19  ;;  %v1004_v63 = vpack.c.bf16 %v550_v4, %v548_v14  ;;  %1125 = vrcp.f32 %v506_v61 }
  0xf1   :  { %v504_v1 = vadd.f32 1.0, %v1114_v16 }
  0xf2   :  { %1127 = vrcp.f32 %v503_v17  ;;  %1005 = vmatprep.subr.bf16.mxu0 %v1004_v63 }
  0xf3   :  { %v1116_v49 = vpop.eup %1115  ;;  %1129 = vrcp.f32 %v504_v1  ;;  %1007 = vmatpush1.bf16.msra.mxu0 %v1006_v32 }
  0xf4   :  { %v1118_v13 = vpop.eup %1117  ;;  %v507_v18 = vadd.f32 1.0, %v1116_v49 }
  0xf5   :  { %v508_v21 = vadd.f32 1.0, %v1118_v13 }
  0xf6   :  { %1131 = vrcp.f32 %v507_v18 }
  0xf7   :  { %v1120_v50 = vpop.eup %1119  ;;  %1133 = vrcp.f32 %v508_v21 }
  0xf8   :  { %v1122_v0 = vpop.eup %1121  ;;  %v509_v20 = vadd.f32 1.0, %v1120_v50 }
  0xf9   :  { %v510_v24 = vadd.f32 1.0, %v1122_v0  ;;  %v1124_v25 = vpop.eup %1123 }
  0xfa   :  { %1135 = vrcp.f32 %v509_v20  ;;  %v1126_v26 = vpop.eup %1125  ;;  %v553_v23 = vmul.f32 %v1124_v25, %v1492_v37 }
  0xfb   :  { %1137 = vrcp.f32 %v510_v24  ;;  %v554_v41 = vmul.f32 %v1126_v26, %v1494_v38 }
  0xfc   :  { %v1128_v40 = vpop.eup %1127 }
  0xfd   :  { %v1130_v29 = vpop.eup %1129  ;;  %v551_v30 = vmul.f32 %v1128_v40, %v1516_v27 }
  0xfe   :  { %v552_v28 = vmul.f32 %v1130_v29, %v1518_v22 }
  0xff   :  { %v1010_v34 = vpack.c.bf16 %v553_v23, %v551_v30 }
 0x100   :  { %v1008_v35 = vpack.c.bf16 %v554_v41, %v552_v28  ;;  %v1132_v36 = vpop.eup %1131 }
 0x101   :  { %v1134_v42 = vpop.eup %1133  ;;  %v555_v6 = vmul.f32 %v1132_v36, %v1526_v43 }
 0x102   :  { %1009 = vmatprep.subr.bf16.mxu0 %v1008_v35  ;;  %v556_v47 = vmul.f32 %v1134_v42, %v1528_v5 }
 0x103   :  { %1011 = vmatpush1.bf16.msra.mxu0 %v1010_v34 }
 0x104   :  { %v1136_v45 = vpop.eup %1135 }
 0x105   :  { %v1138_v46 = vpop.eup %1137  ;;  %v557_v11 = vmul.f32 %v1136_v45, %v445_v53 }
 0x106   :  { %v558_v37 = vmul.f32 %v1138_v46, %v446_v55 }
 0x107   :  { %v1014_v48 = vpack.c.bf16 %v557_v11, %v555_v6 }
 0x108   :  { %v1012_v27 = vpack.c.bf16 %v558_v37, %v556_v47 }
 0x10a   :  { %1013 = vmatprep.subr.bf16.mxu0 %v1012_v27 }
 0x10b   :  { %1015 = vmatpush1.bf16.msra.mxu0 %v1014_v48 }
 0x10e   :  { %975 = vmatmul.mubr.msk.f32.vlgmr.msra.gmra.mrb[0].mxu0 %vm591_vm0, %v1341_v2  ;;  %v256_v2 = vld [vmem:[#allocation5 + $0x41] sm:$0x1] }
 0x10f   :  { %678 = vmatprep.mubr.f32.mxu0 %v1288_v33 }
 0x112   :  { %976 = vmatmul.mubr.msk.f32.gmra.mrb[2].mxu0 %vm591_vm0, %v1345_v3  ;;  %v1290_v3 = vmov 0  }
 0x113   :  { %684 = vmatprep.mubr.f32.mxu0 %v1288_v33  ;;  %1069 = vset.pattern.permute.xlu1 %v1290_v3 }
 0x114   :  { %1070 = vset.pattern.permute.xlu0 %v1290_v3  ;;  %835 = vperm.xlu1 %1069, %v256_v2  }
 0x116   :  { %977 = vmatmul.mubr.msk.f32.gmra.mrb[4].mxu0 %vm591_vm0, %v1352_v7  ;;  %v561_v7 = vpop.permute.xlu0 %560 }
 0x117   :  { %690 = vmatprep.mubr.f32.mxu0 %v1288_v33 }
 0x11a   :  { %978 = vmatmul.mubr.msk.f32.gmra.mrb[6].mxu0 %vm591_vm0, %v1354_v8  ;;  %v573_v59 = vpop.permute.xlu0 %572 }
 0x11b   :  { %696 = vmatprep.mubr.f32.mxu0 %v1288_v33 }
 0x11e   :  { %979 = vmatmul.mubr.msk.f32.gmra.mrb[8].mxu0 %vm591_vm0, %v1366_v15  ;;  %v565_v15 = vpop.permute.xlu1 %564  ;;  %v581_v26 = vpop.permute.xlu0 %580 }
 0x11f   :  { %702 = vmatprep.mubr.f32.mxu0 %v1288_v33 }
 0x122   :  { %980 = vmatmul.mubr.msk.f32.gmra.mrb[10].mxu0 %vm591_vm0, %v1380_v54  ;;  %v569_v9 = vpop.permute.xlu1 %568 }
 0x123   :  { %708 = vmatprep.mubr.f32.mxu0 %v1288_v33 }
 0x126   :  { %981 = vmatmul.mubr.msk.f32.gmra.mrb[12].mxu0 %vm591_vm0, %v1370_v31  ;;  %v577_v63 = vpop.permute.xlu1 %576 }
 0x127   :  { %714 = vmatprep.mubr.f32.mxu0 %v1288_v33 }
 0x12a   :  { %982 = vmatmul.mubr.msk.f32.gmra.mrb[14].mxu0 %vm591_vm0, %v1404_v12  ;;  %v585_v45 = vpop.permute.xlu1 %584 }
 0x1e1   :  { %v674_v8 = vpop.f32.mrb[0].mxu0 }
 0x1e2   :  { %v1565_v38 = vadd.f32 %v674_v8, %v561_v7  ;;  %v676_v54 = vpop.f32.mrb[1].mxu0  ;;  %v589_v8 = vpop.permute.xlu0 %588 }
 0x1e3   :  { %v1567_v22 = vadd.f32 %v676_v54, %v561_v7 }
 0x1e4   :  { %v983_v31 = vmul.f32 -1.442695, %v1565_v38 }
 0x1e5   :  { %v984_v33 = vmul.f32 -1.442695, %v1567_v22  ;;  %v680_v43 = vpop.f32.mrb[2].mxu0 }
 0x1e6   :  { %1139 = vpow2.f32 %v983_v31  ;;  %v1571_v12 = vadd.f32 %v680_v43, %v565_v15  ;;  %v682_v5 = vpop.f32.mrb[3].mxu0 }
 0x1e7   :  { %1141 = vpow2.f32 %v984_v33  ;;  %v1573_v51 = vadd.f32 %v682_v5, %v565_v15 }
 0x1e8   :  { %v985_v53 = vmul.f32 -1.442695, %v1571_v12 }
 0x1e9   :  { %v986_v55 = vmul.f32 -1.442695, %v1573_v51  ;;  %v686_v10 = vpop.f32.mrb[4].mxu0 }
 0x1ea   :  { %1143 = vpow2.f32 %v985_v53  ;;  %v1577_v39 = vadd.f32 %v686_v10, %v569_v9  ;;  %v688_v56 = vpop.f32.mrb[5].mxu0 }
 0x1eb   :  { %1145 = vpow2.f32 %v986_v55  ;;  %v1579_v57 = vadd.f32 %v688_v56, %v569_v9 }
 0x1ec   :  { %v987_v58 = vmul.f32 -1.442695, %v1577_v39 }
 0x1ed   :  { %v988_v60 = vmul.f32 -1.442695, %v1579_v57  ;;  %v692_v61 = vpop.f32.mrb[6].mxu0 }
 0x1ee   :  { %1147 = vpow2.f32 %v987_v58  ;;  %v1583_v62 = vadd.f32 %v692_v61, %v573_v59  ;;  %v694_v4 = vpop.f32.mrb[7].mxu0 }
 0x1ef   :  { %1149 = vpow2.f32 %v988_v60  ;;  %v1585_v14 = vadd.f32 %v694_v4, %v573_v59 }
 0x1f0   :  { %v1140_v19 = vpop.eup %1139  ;;  %v989_v32 = vmul.f32 -1.442695, %v1583_v62 }
 0x1f1   :  { %v1142_v16 = vpop.eup %1141  ;;  %v769_v17 = vadd.f32 1.0, %v1140_v19  ;;  %v990_v1 = vmul.f32 -1.442695, %v1585_v14  ;;  %v698_v49 = vpop.f32.mrb[8].mxu0 }
 0x1f2   :  { %v770_v13 = vadd.f32 1.0, %v1142_v16  ;;  %1151 = vpow2.f32 %v989_v32  ;;  %v1589_v18 = vadd.f32 %v698_v49, %v577_v63  ;;  %v700_v21 = vpop.f32.mrb[9].mxu0 }
 0x1f3   :  { %1153 = vrcp.f32 %v769_v17  ;;  %v1591_v50 = vadd.f32 %v700_v21, %v577_v63 }
 0x1f4   :  { %v1144_v0 = vpop.eup %1143  ;;  %1155 = vrcp.f32 %v770_v13  ;;  %v991_v20 = vmul.f32 -1.442695, %v1589_v18 }
 0x1f5   :  { %v1146_v24 = vpop.eup %1145  ;;  %v771_v25 = vadd.f32 1.0, %v1144_v0  ;;  %1157 = vpow2.f32 %v990_v1  ;;  %v992_v40 = vmul.f32 -1.442695, %v1591_v50  ;;  %v704_v29 = vpop.f32.mrb[10].mxu0 }
 0x1f6   :  { %v772_v23 = vadd.f32 1.0, %v1146_v24  ;;  %1159 = vpow2.f32 %v991_v20  ;;  %v1595_v30 = vadd.f32 %v704_v29, %v581_v26  ;;  %v706_v41 = vpop.f32.mrb[11].mxu0 }
 0x1f7   :  { %1161 = vrcp.f32 %v771_v25  ;;  %v1597_v28 = vadd.f32 %v706_v41, %v581_v26 }
 0x1f8   :  { %v1148_v34 = vpop.eup %1147  ;;  %1163 = vrcp.f32 %v772_v23  ;;  %v993_v35 = vmul.f32 -1.442695, %v1595_v30 }
 0x1f9   :  { %v1150_v36 = vpop.eup %1149  ;;  %v773_v42 = vadd.f32 1.0, %v1148_v34  ;;  %1165 = vpow2.f32 %v992_v40  ;;  %v994_v46 = vmul.f32 -1.442695, %v1597_v28  ;;  %v710_v6 = vpop.f32.mrb[12].mxu0 }
 0x1fa   :  { %v774_v11 = vadd.f32 1.0, %v1150_v36  ;;  %1167 = vpow2.f32 %v993_v35  ;;  %v1601_v47 = vadd.f32 %v710_v6, %v585_v45  ;;  %v712_v37 = vpop.f32.mrb[13].mxu0 }
 0x1fb   :  { %1169 = vrcp.f32 %v773_v42  ;;  %v1603_v48 = vadd.f32 %v712_v37, %v585_v45 }
 0x1fc   :  { %v1152_v27 = vpop.eup %1151  ;;  %1171 = vrcp.f32 %v774_v11  ;;  %v995_v2 = vmul.f32 -1.442695, %v1601_v47 }
 0x1fd   :  { %v1154_v3 = vpop.eup %1153  ;;  %v775_v7 = vadd.f32 1.0, %v1152_v27  ;;  %1173 = vpow2.f32 %v994_v46  ;;  %v996_v15 = vmul.f32 -1.442695, %v1603_v48  ;;  %v716_v54 = vpop.f32.mrb[14].mxu0 }
 0x1fe   :  { %v1156_v31 = vpop.eup %1155  ;;  %1175 = vpow2.f32 %v995_v2  ;;  %v1607_v33 = vadd.f32 %v716_v54, %v589_v8  ;;  %v718_v43 = vpop.f32.mrb[15].mxu0  ;;  %v817_v61 = vmul.f32 %v1154_v3, %v1565_v38 }
 0x1ff   :  { %v1158_v5 = vpop.eup %1157  ;;  %1177 = vrcp.f32 %v775_v7  ;;  %v1609_v9 = vadd.f32 %v718_v43, %v589_v8  ;;  %v818_v32 = vmul.f32 %v1156_v31, %v1567_v22 }
 0x200   :  { %v1160_v53 = vpop.eup %1159  ;;  %v776_v55 = vadd.f32 1.0, %v1158_v5  ;;  %1179 = vpow2.f32 %v996_v15  ;;  %v997_v10 = vmul.f32 -1.442695, %v1607_v33 }
 0x201   :  { %v1162_v56 = vpop.eup %1161  ;;  %v777_v58 = vadd.f32 1.0, %v1160_v53  ;;  %v998_v59 = vmul.f32 -1.442695, %v1609_v9 }
 0x202   :  { %v1164_v60 = vpop.eup %1163  ;;  %v819_v4 = vmul.f32 %v1162_v56, %v1571_v12  ;;  %1181 = vrcp.f32 %v776_v55 }
 0x203   :  { %v1166_v19 = vpop.eup %1165  ;;  %1183 = vrcp.f32 %v777_v58  ;;  %v820_v16 = vmul.f32 %v1164_v60, %v1573_v51 }
 0x204   :  { %v1168_v17 = vpop.eup %1167  ;;  %v778_v63 = vadd.f32 1.0, %v1166_v19  ;;  %1185 = vpow2.f32 %v997_v10  ;;  %v1018_v1 = vpack.c.bf16 %v819_v4, %v817_v61  ;;  %v836_v10 = vpop.permute.xlu1 %835 }
 0x205   :  { %v1170_v49 = vpop.eup %1169  ;;  %v779_v13 = vadd.f32 1.0, %v1168_v17  ;;  %1187 = vpow2.f32 %v998_v59  ;;  %v1016_v21 = vpack.c.bf16 %v820_v16, %v818_v32 }
 0x206   :  { %v1172_v0 = vpop.eup %1171  ;;  %v821_v51 = vmul.f32 %v1170_v49, %v1577_v39 }
 0x207   :  { %v1174_v20 = vpop.eup %1173  ;;  %1189 = vrcp.f32 %v779_v13  ;;  %1017 = vmatprep.subr.bf16.mxu1 %v1016_v21  ;;  %v822_v34 = vmul.f32 %v1172_v0, %v1579_v57 }
 0x208   :  { %v1176_v38 = vpop.eup %1175  ;;  %1191 = vrcp.f32 %v778_v63  ;;  %v780_v12 = vadd.f32 1.0, %v1174_v20  ;;  %1019 = vmatpush1.bf16.msra.mxu1 %v1018_v1 }
 0x209   :  { %v1178_v24 = vpop.eup %1177  ;;  %v781_v26 = vadd.f32 1.0, %v1176_v38 }
 0x20a   :  { %v1180_v22 = vpop.eup %1179  ;;  %v823_v25 = vmul.f32 %v1178_v24, %v1583_v62  ;;  %1193 = vrcp.f32 %v780_v12 }
 0x20b   :  { %v782_v29 = vadd.f32 1.0, %v1180_v22  ;;  %1195 = vrcp.f32 %v781_v26 }
 0x20c   :  { %v1182_v40 = vpop.eup %1181  ;;  %v1022_v23 = vpack.c.bf16 %v823_v25, %v821_v51 }
 0x20d   :  { %v1184_v41 = vpop.eup %1183  ;;  %v824_v35 = vmul.f32 %v1182_v40, %v1585_v14  ;;  %1197 = vrcp.f32 %v782_v29 }
 0x20e   :  { %v1186_v36 = vpop.eup %1185  ;;  %v825_v11 = vmul.f32 %v1184_v41, %v1589_v18 }
 0x20f   :  { %v1188_v42 = vpop.eup %1187  ;;  %v783_v45 = vadd.f32 1.0, %v1186_v36  ;;  %v1020_v46 = vpack.c.bf16 %v824_v35, %v822_v34 }
 0x210   :  { %v784_v6 = vadd.f32 1.0, %v1188_v42 }
 0x211   :  { %v1190_v39 = vpop.eup %1189  ;;  %1199 = vrcp.f32 %v783_v45  ;;  %1021 = vmatprep.subr.bf16.mxu1 %v1020_v46 }
 0x212   :  { %v1192_v62 = vpop.eup %1191  ;;  %v827_v37 = vmul.f32 %v1190_v39, %v1595_v30  ;;  %1201 = vrcp.f32 %v784_v6  ;;  %1023 = vmatpush1.bf16.msra.mxu1 %v1022_v23 }
 0x213   :  { %v826_v14 = vmul.f32 %v1192_v62, %v1591_v50  ;;  %v255_v50 = vld [vmem:[#allocation5 + $0x40] sm:$0x1] }
 0x214   :  { %v1194_v57 = vpop.eup %1193  ;;  %v1026_v27 = vpack.c.bf16 %v827_v37, %v825_v11 }
 0x215   :  { %v828_v2 = vmul.f32 %v1194_v57, %v1597_v28  ;;  %v1196_v7 = vpop.eup %1195  ;;  %v1291_v28 = vmov 1966171168  }
 0x216   :  { %v829_v31 = vmul.f32 %v1196_v7, %v1601_v47  ;;  %v916_v55 = vunpack.c.l.s4 %v1291_v28 }
 0x217   :  { %v1024_v3 = vpack.c.bf16 %v828_v2, %v826_v14  ;;  %v1198_v8 = vpop.eup %1197 }
 0x218   :  { %v830_v30 = vmul.f32 %v1198_v8, %v1603_v48  ;;  %v917_v56 = vunpack.c.0.s8 %v916_v55 }
 0x219   :  { %1025 = vmatprep.subr.bf16.mxu1 %v1024_v3 }
 0x21a   :  { %1027 = vmatpush1.bf16.msra.mxu1 %v1026_v27 }
 0x21b   :  { %v1200_v15 = vpop.eup %1199 }
 0x21c   :  { %v1202_v54 = vpop.eup %1201  ;;  %v831_v18 = vmul.f32 %v1200_v15, %v1607_v33  ;;  %v920_v33 = vsub.s32 %v917_v56, %v1421_v52 }
 0x21d   :  { %v832_v43 = vmul.f32 %v1202_v54, %v1609_v9 }
 0x21e   :  { %v1030_v5 = vpack.c.bf16 %v831_v18, %v829_v31 }
 0x21f   :  { %v1028_v53 = vpack.c.bf16 %v832_v43, %v830_v30 }
 0x221   :  { %1029 = vmatprep.subr.bf16.mxu1 %v1028_v53 }
 0x222   :  { %1031 = vmatpush1.bf16.msra.mxu1 %v1030_v5 }
 0x225   :  { %999 = vmatmul.mubr.msk.f32.vlgmr.msra.gmra.mrb[0].mxu1 %vm591_vm0, %v255_v50 }
 0x2f8   :  { %v907_v58 = vpop.f32.mrb[0].mxu1 }
 0x2f9   :  { %v908_v59 = vadd.f32 %v907_v58, %v836_v10  ;;  %v909_v47 = vpop.f32.mrb[1].mxu1 }
 0x2fa   :  { %v910_v60 = vadd.f32 %v909_v47, %v836_v10 }
 0x2fc   :  { %v914_v48 = vcombine.low %v908_v59, %v910_v60 }
 0x2fe   :  { %v921_v9 = vrot.slane %v914_v48, %v920_v33 }
 0x300   :  { %v928_v61 = vrot.slane %v921_v9, %v920_v33 }
 0x302   :  { %934 = vst.msk [vmem:[#allocation7] sm:$0x3] %vm932_vm1, %v928_v61 }
 0x303   :  { %1258 = shalt.err (!%p1255_p6)
}
 0x304   :  { %s1259_s10 = scalar_lea.hbm %s1646_s2, 32 }
 0x305   :  { %p1260_p7 = scmp.ne.s32.totalorder %s1646_s2, %s1259_s10  ;;  %p1263_p8 = scmp.lt.u32.totalorder %s1259_s10, %s1646_s2 }
 0x307   :  { %p1265_p9 = pnand %p1263_p8, %p1260_p7 }
 0x309   :  { %1268 = shalt.err (!%p1265_p9)
}
 0x30a   :  { %944 = dma.vmem_to_hbm [thread:$0]  %s942_s6, 32, %s1646_s2, [#allocation4]  }
 0x30b   :  { %1273 = dma.done.wait [#allocation4], 32  }
 0x30c   :  { %1274 = vsyncadd [#allocation4], 4294967264 }
 0x30d   :  { %948 = vsyncpa [#allocation3], 1 }
 0x30e   :  { %949 = vsyncpa [#allocation6], 1 }
 0x30f   :  { %950 = vsyncpa [#allocation4], 1 }

</bundles_post_ra>
